<compile_context>
chip_gen: v6e
topology: v6e:2x2x1
jax: 0.10.0
libtpu: 0.0.40
codegen_flags: <defaults>
</compile_context>

<pallas_src>
import functools

import numpy as np
import jax
import jax.numpy as jnp
from jax.experimental import pallas as pl
from jax.experimental.pallas import tpu as pltpu


LANE = 128                    # lane width: all layer output widths padded to this
ROW_TILES = (1024, 512, 256)  # candidate batch tiles for the gridded path
MIN_GRID_STEPS = 4            # >= 2 grid steps per v7x TensorCore


def _round_up(n, m):
    return ((n + m - 1) // m) * m


# ----------------------------------------------------------------------------
# Fused kernel: conv1 -> ReLU -> conv2 -> ReLU -> fc1 -> ReLU -> fc2 as four
# back-to-back MXU matmuls.  Intermediates never leave VMEM / vregs.
# ----------------------------------------------------------------------------
def _fused_kernel(x_ref, w1_ref, b1_ref, w2_ref, b2_ref,
                  w3_ref, b3_ref, w4_ref, b4_ref, o_ref):
    def mm(a, w_ref, b_ref, relu):
        w = w_ref[...]
        # bf16 weights (default): cast only the MXU inputs, keep f32
        # accumulation and an f32 bias/ReLU epilogue.
        # f32 weights (validation packing): force full-precision MXU passes so
        # the exact-math check below is meaningful.
        prec = jax.lax.Precision.HIGHEST if w.dtype == jnp.float32 else None
        y = jnp.dot(a.astype(w.dtype), w, precision=prec,
                    preferred_element_type=jnp.float32) + b_ref[...]
        return jnp.maximum(y, 0.0) if relu else y

    h = mm(x_ref[...], w1_ref, b1_ref, True)     # conv1 + ReLU   (tb, 384)
    h = mm(h, w2_ref, b2_ref, True)              # conv2 + ReLU   (tb, 640)
    h = mm(h, w3_ref, b3_ref, True)              # fc1   + ReLU   (tb, 256)
    o_ref[...] = mm(h, w4_ref, b4_ref, False).astype(o_ref.dtype)   # (tb, 128)


# ----------------------------------------------------------------------------
# Weight packing (done ONCE, outside the per-step graph).
# ----------------------------------------------------------------------------
def _conv3x3_same_as_dense(w_oihw, b_o, H, W):
    """Exact dense lowering of a 3x3, padding=1, stride=1 conv on an HxW grid.

    Row index    = cin  * H*W + ih*W + iw   (NCHW flatten of the input)
    Column index = cout * H*W + oh*W + ow   (NCHW flatten of the output)
    """
    w = np.asarray(w_oihw, dtype=np.float32)
    O, I, KH, KW = w.shape
    m = np.zeros((I, H * W, O, H * W), dtype=np.float32)
    for oh in range(H):
        for ow in range(W):
            for kh in range(KH):
                for kw in range(KW):
                    ih, iw = oh + kh - 1, ow + kw - 1
                    if 0 <= ih < H and 0 <= iw < W:
                        m[:, ih * W + iw, :, oh * W + ow] = w[:, :, kh, kw].T
    b_big = np.repeat(np.asarray(b_o, dtype=np.float32), H * W)
    return m.reshape(I * H * W, O * H * W), b_big


def _pad2d(a, rows, cols):
    out = np.zeros((rows, cols), np.float32)
    out[: a.shape[0], : a.shape[1]] = a
    return out


def _pad1d(a, n):
    out = np.zeros((n,), np.float32)
    out[: a.shape[0]] = a
    return out


def pack_params(params, grid_size=3, compute_dtype=jnp.bfloat16):
    """Fold the conv lowering, the PyTorch NCHW-flatten permutation, the fc
    transposes and ALL lane paddings into the stored weights.

    Padding is exact: padded output columns have zero weights and zero biases
    (ReLU gives 0 there) and they feed zero rows of the next layer.
    """
    H = W = grid_size
    w1, b1 = _conv3x3_same_as_dense(params["conv1_w"], params["conv1_b"], H, W)
    w2, b2 = _conv3x3_same_as_dense(params["conv2_w"], params["conv2_b"], H, W)
    w3 = np.asarray(params["fc1_w"], np.float32).T          # (64*H*W, 256)
    b3 = np.asarray(params["fc1_b"], np.float32)
    w4 = np.asarray(params["fc2_w"], np.float32).T          # (256, A)
    b4 = np.asarray(params["fc2_b"], np.float32)

    k_in = w1.shape[0]                                      # Cin*H*W (input stays unpadded)
    n1 = _round_up(w1.shape[1], LANE)                       # 288 -> 384
    n2 = _round_up(w2.shape[1], LANE)                       # 576 -> 640
    n3 = _round_up(w3.shape[1], LANE)                       # 256 -> 256
    n4 = _round_up(w4.shape[1], LANE)                       # A   -> 128

    w1p = _pad2d(w1, k_in, n1)
    w2p = _pad2d(w2, n1, n2)      # zero rows 288..383 absorb conv1's pad columns
    w3p = _pad2d(w3, n2, n3)      # zero rows 576..639 absorb conv2's pad columns
    w4p = _pad2d(w4, n3, n4)

    cd, f32 = compute_dtype, jnp.float32
    return {
        "w1": jnp.asarray(w1p, cd), "b1": jnp.asarray(_pad1d(b1, n1).reshape(1, -1), f32),
        "w2": jnp.asarray(w2p, cd), "b2": jnp.asarray(_pad1d(b2, n2).reshape(1, -1), f32),
        "w3": jnp.asarray(w3p, cd), "b3": jnp.asarray(_pad1d(b3, n3).reshape(1, -1), f32),
        "w4": jnp.asarray(w4p, cd), "b4": jnp.asarray(_pad1d(b4, n4).reshape(1, -1), f32),
    }


# ----------------------------------------------------------------------------
# Pallas call wrapper.
# ----------------------------------------------------------------------------
def _pick_row_tile(batch):
    """Largest tile that still gives >= MIN_GRID_STEPS grid steps, else None."""
    for t in ROW_TILES:
        if batch >= MIN_GRID_STEPS * t:
            return t
    return None


def _cost(batch, args, n_out):
    flops = 2 * batch * sum(int(a.shape[0]) * int(a.shape[1])
                            for a in (args[1], args[3], args[5], args[7]))
    bytes_accessed = (sum(int(a.size) * a.dtype.itemsize for a in args)
                      + 4 * batch * n_out)
    return pl.CostEstimate(flops=flops, transcendentals=0,
                           bytes_accessed=bytes_accessed)


def _pallas_forward(x_flat, packed):
    B, k_in = x_flat.shape
    weights = (packed["w1"], packed["b1"], packed["w2"], packed["b2"],
               packed["w3"], packed["b3"], packed["w4"], packed["b4"])
    n_out = packed["w4"].shape[1]

    tile = _pick_row_tile(B)
    if tile is None:
        # Small / modest batch (the DQN acting path, e.g. B=2): one un-gridded
        # call, every operand a single VMEM-resident block -- zero grid or
        # pipelining overhead.  Worst case here (B < 4*256) is < ~6 MB of f32
        # intermediates, far inside the default scoped VMEM limit.
        # TODO(synk): for a latency-critical acting path, keep packed weights
        # resident across calls (cross-pallas_call futures) instead of
        # re-streaming ~0.7 MB of bf16 weights from HBM every inference.
        args = (x_flat,) + weights
        vmem = lambda: pl.BlockSpec(memory_space=pltpu.MemorySpace.VMEM)
        return pl.pallas_call(
            _fused_kernel,
            out_shape=jax.ShapeDtypeStruct((B, n_out), jnp.float32),
            in_specs=[vmem() for _ in args],
            out_specs=vmem(),
            cost_estimate=_cost(B, args, n_out),
        )(*args)

    # Replay/training batch: pad rows up to a tile multiple (cdiv-robust, no
    # silent single-block fallback), pipeline the activation stream over a row
    # grid with all weights fully resident, and let "parallel" split rows over
    # v7x's two TensorCores.  The grid always has >= MIN_GRID_STEPS steps so
    # each core keeps double-buffering.
    n_steps = pl.cdiv(B, tile)
    b_pad = n_steps * tile
    if b_pad != B:
        x_flat = jnp.pad(x_flat, ((0, b_pad - B), (0, 0)))
    args = (x_flat,) + weights

    # Weight/bias block indices are grid-invariant -> DMA'd once, never
    # re-fetched.  (pl.Buffered(1) could drop their double buffer, but at
    # ~0.9 MB of bf16 weights it is unnecessary even on v7x's 64 MiB VMEM.)
    whole = lambda a: pl.BlockSpec(a.shape, lambda i: (0, 0))
    in_specs = [pl.BlockSpec((tile, k_in), lambda i: (i, 0))]
    in_specs += [whole(a) for a in weights]

    out = pl.pallas_call(
        _fused_kernel,
        out_shape=jax.ShapeDtypeStruct((b_pad, n_out), jnp.float32),
        grid=(n_steps,),
        in_specs=in_specs,
        out_specs=pl.BlockSpec((tile, n_out), lambda i: (i, 0)),
        compiler_params=pltpu.CompilerParams(
            dimension_semantics=("parallel",)),
        cost_estimate=_cost(b_pad, args, n_out),
    )(*args)
    return out[:B] if b_pad != B else out


@functools.partial(jax.jit, static_argnames=("action_size",))
def cnn_qnetwork_forward(x_nchw, packed, action_size=4):
    B = x_nchw.shape[0]
    x_flat = x_nchw.reshape(B, -1).astype(jnp.float32)     # free NCHW flatten
    q_padded = _pallas_forward(x_flat, packed)
    return q_padded[:, :action_size]


# ----------------------------------------------------------------------------
# Parameter init (PyTorch-style layouts) and a pure-JAX reference for checking.
# ----------------------------------------------------------------------------
def init_params(key, input_channels=3, action_size=4, grid_size=3):
    ks = jax.random.split(key, 8)
    flat = 64 * grid_size * grid_size

    def u(k, shape, fan_in):
        bound = 1.0 / jnp.sqrt(float(fan_in))
        return jax.random.uniform(k, shape, jnp.float32, -bound, bound)

    return {
        "conv1_w": u(ks[0], (32, input_channels, 3, 3), input_channels * 9),
        "conv1_b": u(ks[1], (32,), input_channels * 9),
        "conv2_w": u(ks[2], (64, 32, 3, 3), 32 * 9),
        "conv2_b": u(ks[3], (64,), 32 * 9),
        "fc1_w":   u(ks[4], (256, flat), flat),            # PyTorch Linear: (out, in)
        "fc1_b":   u(ks[5], (256,), flat),
        "fc2_w":   u(ks[6], (action_size, 256), 256),
        "fc2_b":   u(ks[7], (action_size,), 256),
    }


def reference_forward(x_nchw, params):
    """Pure-JAX replica of the PyTorch module, full f32 precision everywhere."""
    prec = jax.lax.Precision.HIGHEST
    x = x_nchw.astype(jnp.float32)
    y = jax.lax.conv_general_dilated(
        x, params["conv1_w"], window_strides=(1, 1),
        padding=((1, 1), (1, 1)), dimension_numbers=("NCHW", "OIHW", "NCHW"),
        precision=prec)
    y = jax.nn.relu(y + params["conv1_b"][None, :, None, None])
    y = jax.lax.conv_general_dilated(
        y, params["conv2_w"], window_strides=(1, 1),
        padding=((1, 1), (1, 1)), dimension_numbers=("NCHW", "OIHW", "NCHW"),
        precision=prec)
    y = jax.nn.relu(y + params["conv2_b"][None, :, None, None])
    flat = y.reshape(y.shape[0], -1)                        # NCHW flatten
    h = jax.nn.relu(jnp.dot(flat, params["fc1_w"].T, precision=prec)
                    + params["fc1_b"])
    return jnp.dot(h, params["fc2_w"].T, precision=prec) + params["fc2_b"]


if __name__ == "__main__":
    key = jax.random.PRNGKey(0)
    k_params, k_x, k_xb = jax.random.split(key, 3)

    batch, input_channels, grid_size, action_size = 2, 3, 3, 4
    params = init_params(k_params, input_channels, action_size, grid_size)

    packed_bf16 = pack_params(params, grid_size=grid_size)                 # default (fast)
    packed_f32 = pack_params(params, grid_size=grid_size,
                             compute_dtype=jnp.float32)                    # exact-math check

    # --- Acting path (small batch, un-gridded single-block call) -----------
    x = jax.random.normal(k_x, (batch, input_channels, grid_size, grid_size),
                          dtype=jnp.float32)
    q = jax.block_until_ready(
        cnn_qnetwork_forward(x, packed_bf16, action_size=action_size))
    assert q.shape == (batch, action_size), q.shape
    assert q.dtype == jnp.float32

    q_ref = jax.block_until_ready(reference_forward(x, params))

    # Exact-math validation: f32 packing (HIGHEST-precision MXU) matches the
    # PyTorch semantics to tight tolerance -> the conv lowering / padding /
    # fusion are exact.
    q_f32 = jax.block_until_ready(
        cnn_qnetwork_forward(x, packed_f32, action_size=action_size))
    np.testing.assert_allclose(np.asarray(q_f32), np.asarray(q_ref),
                               rtol=1e-4, atol=1e-4)

    # Default bf16-input path: looser tolerance (bf16 weight/activation
    # rounding; structural/indexing errors would be orders of magnitude worse).
    np.testing.assert_allclose(np.asarray(q), np.asarray(q_ref),
                               rtol=5e-2, atol=5e-2)

    # --- Replay/training path (cdiv-robust row grid, B not a tile multiple) -
    b_big = 1111   # -> padded to 1280, grid of 5 x 256-row parallel steps
    xb = jax.random.normal(
        k_xb, (b_big, input_channels, grid_size, grid_size), dtype=jnp.float32)
    qb = jax.block_until_ready(
        cnn_qnetwork_forward(xb, packed_bf16, action_size=action_size))
    assert qb.shape == (b_big, action_size), qb.shape
    qb_ref = jax.block_until_ready(reference_forward(xb, params))
    np.testing.assert_allclose(np.asarray(qb), np.asarray(qb_ref),
                               rtol=5e-2, atol=5e-2)

    print("KERNEL_OK")
</pallas_src>

<mosaic_0001>
module attributes {stable_mosaic.version = 11 : i64} {
  func.func @_fused_kernel(%arg0: memref<2x27xf32, #tpu.memory_space<vmem>>, %arg1: memref<27x384xbf16, #tpu.memory_space<vmem>>, %arg2: memref<1x384xf32, #tpu.memory_space<vmem>>, %arg3: memref<384x640xbf16, #tpu.memory_space<vmem>>, %arg4: memref<1x640xf32, #tpu.memory_space<vmem>>, %arg5: memref<640x256xbf16, #tpu.memory_space<vmem>>, %arg6: memref<1x256xf32, #tpu.memory_space<vmem>>, %arg7: memref<256x128xbf16, #tpu.memory_space<vmem>>, %arg8: memref<1x128xf32, #tpu.memory_space<vmem>>, %arg9: memref<2x128xf32, #tpu.memory_space<vmem>>) attributes {dimension_semantics = [], scalar_prefetch = 0 : i64, scratch_operands = 0 : i64, tpu.core_type = #tpu.core_type<tc>} {
    %c0 = arith.constant 0 : index
    %c0_0 = arith.constant 0 : index
    %0 = vector.load %arg0[%c0, %c0_0] : memref<2x27xf32, #tpu.memory_space<vmem>>, vector<2x27xf32>
    %c0_1 = arith.constant 0 : index
    %c0_2 = arith.constant 0 : index
    %1 = vector.load %arg1[%c0_1, %c0_2] : memref<27x384xbf16, #tpu.memory_space<vmem>>, vector<27x384xbf16>
    %2 = arith.truncf %0 : vector<2x27xf32> to vector<2x27xbf16>
    %cst = arith.constant dense<0.000000e+00> : vector<2x384xf32>
    %3 = tpu.matmul %2, %1, %cst {dimension_numbers = #tpu.dot_dimension_numbers<[1], [0], [0], [1], [0, 0, 1, 1], [], []>} : vector<2x27xbf16>, vector<27x384xbf16>, vector<2x384xf32> -> vector<2x384xf32>
    %c0_3 = arith.constant 0 : index
    %c0_4 = arith.constant 0 : index
    %4 = vector.load %arg2[%c0_3, %c0_4] : memref<1x384xf32, #tpu.memory_space<vmem>>, vector<1x384xf32>
    %5 = vector.broadcast %4 : vector<1x384xf32> to vector<2x384xf32>
    %6 = arith.addf %3, %5 : vector<2x384xf32>
    %cst_5 = arith.constant 0.000000e+00 : f32
    %7 = vector.broadcast %cst_5 : f32 to vector<2x384xf32>
    %8 = arith.maximumf %6, %7 : vector<2x384xf32>
    %c0_6 = arith.constant 0 : index
    %c0_7 = arith.constant 0 : index
    %9 = vector.load %arg3[%c0_6, %c0_7] : memref<384x640xbf16, #tpu.memory_space<vmem>>, vector<384x640xbf16>
    %10 = arith.truncf %8 : vector<2x384xf32> to vector<2x384xbf16>
    %cst_8 = arith.constant dense<0.000000e+00> : vector<2x640xf32>
    %11 = tpu.matmul %10, %9, %cst_8 {dimension_numbers = #tpu.dot_dimension_numbers<[1], [0], [0], [1], [0, 0, 1, 1], [], []>} : vector<2x384xbf16>, vector<384x640xbf16>, vector<2x640xf32> -> vector<2x640xf32>
    %c0_9 = arith.constant 0 : index
    %c0_10 = arith.constant 0 : index
    %12 = vector.load %arg4[%c0_9, %c0_10] : memref<1x640xf32, #tpu.memory_space<vmem>>, vector<1x640xf32>
    %13 = vector.broadcast %12 : vector<1x640xf32> to vector<2x640xf32>
    %14 = arith.addf %11, %13 : vector<2x640xf32>
    %cst_11 = arith.constant 0.000000e+00 : f32
    %15 = vector.broadcast %cst_11 : f32 to vector<2x640xf32>
    %16 = arith.maximumf %14, %15 : vector<2x640xf32>
    %c0_12 = arith.constant 0 : index
    %c0_13 = arith.constant 0 : index
    %17 = vector.load %arg5[%c0_12, %c0_13] : memref<640x256xbf16, #tpu.memory_space<vmem>>, vector<640x256xbf16>
    %18 = arith.truncf %16 : vector<2x640xf32> to vector<2x640xbf16>
    %cst_14 = arith.constant dense<0.000000e+00> : vector<2x256xf32>
    %19 = tpu.matmul %18, %17, %cst_14 {dimension_numbers = #tpu.dot_dimension_numbers<[1], [0], [0], [1], [0, 0, 1, 1], [], []>} : vector<2x640xbf16>, vector<640x256xbf16>, vector<2x256xf32> -> vector<2x256xf32>
    %c0_15 = arith.constant 0 : index
    %c0_16 = arith.constant 0 : index
    %20 = vector.load %arg6[%c0_15, %c0_16] : memref<1x256xf32, #tpu.memory_space<vmem>>, vector<1x256xf32>
    %21 = vector.broadcast %20 : vector<1x256xf32> to vector<2x256xf32>
    %22 = arith.addf %19, %21 : vector<2x256xf32>
    %cst_17 = arith.constant 0.000000e+00 : f32
    %23 = vector.broadcast %cst_17 : f32 to vector<2x256xf32>
    %24 = arith.maximumf %22, %23 : vector<2x256xf32>
    %c0_18 = arith.constant 0 : index
    %c0_19 = arith.constant 0 : index
    %25 = vector.load %arg7[%c0_18, %c0_19] : memref<256x128xbf16, #tpu.memory_space<vmem>>, vector<256x128xbf16>
    %26 = arith.truncf %24 : vector<2x256xf32> to vector<2x256xbf16>
    %cst_20 = arith.constant dense<0.000000e+00> : vector<2x128xf32>
    %27 = tpu.matmul %26, %25, %cst_20 {dimension_numbers = #tpu.dot_dimension_numbers<[1], [0], [0], [1], [0, 0, 1, 1], [], []>} : vector<2x256xbf16>, vector<256x128xbf16>, vector<2x128xf32> -> vector<2x128xf32>
    %c0_21 = arith.constant 0 : index
    %c0_22 = arith.constant 0 : index
    %28 = vector.load %arg8[%c0_21, %c0_22] : memref<1x128xf32, #tpu.memory_space<vmem>>, vector<1x128xf32>
    %29 = vector.broadcast %28 : vector<1x128xf32> to vector<2x128xf32>
    %30 = arith.addf %27, %29 : vector<2x128xf32>
    %c0_23 = arith.constant 0 : index
    %c0_24 = arith.constant 0 : index
    %31 = vector.load %arg9[%c0_23, %c0_24] : memref<2x128xf32, #tpu.memory_space<vmem>>, vector<2x128xf32>
    tpu.vector_store %arg9[%c0_23, %c0_24], %30 {strides = array<i32>} : memref<2x128xf32, #tpu.memory_space<vmem>>, vector<2x128xf32>,
    return
  }
}

</mosaic_0001>

<bundles_post_ra>
// kernel: cnn_qnetwork_forward.1
= control target key start
LH: loop header
LB: loop body
LE: loop exit
PB: predicated region body
PF: predicated region fallthrough
CT: control target
= control target key end

     0   :  { %14 = vsyncpa [#allocation3], 0  ;;  %s2986_s0 = inlined_call_operand.vmem [shape: f32[2,27], index: 0, kind: input, shape index: {}]   ;;  %s2987_s1 = inlined_call_operand.vmem [shape: bf16[27,384], index: 1, kind: input, shape index: {}]   ;;  %s2988_s2 = inlined_call_operand.vmem [shape: f32[1,384], index: 2, kind: input, shape index: {}]   ;;  %s2989_s3 = inlined_call_operand.hbm [shape: bf16[384,640], index: 3, kind: input, shape index: {}]   ;;  %s2990_s4 = inlined_call_operand.vmem [shape: f32[1,640], index: 4, kind: input, shape index: {}]   ;;  %s2991_s5 = inlined_call_operand.hbm [shape: bf16[640,256], index: 5, kind: input, shape index: {}]   ;;  %s2992_s6 = inlined_call_operand.vmem [shape: f32[1,256], index: 6, kind: input, shape index: {}]   ;;  %s2993_s7 = inlined_call_operand.hbm [shape: bf16[256,128], index: 7, kind: input, shape index: {}]   ;;  %s2994_s8 = inlined_call_operand.vmem [shape: f32[1,128], index: 8, kind: input, shape index: {}]   ;;  %s2995_s9 = inlined_call_operand.hbm [shape: f32[2,128], index: 9, kind: output, shape index: {}]  }
   0x1   :  { %15 = vsyncpa [#allocation6], 0 }
   0x2   :  { %16 = vsyncpa [#allocation4], 0  ;;  %s2816_s30 = smov [#allocation5]  }
   0x3   :  { %s42_s10 = sshll.u32 %s2816_s30, 4  ;;  %s43_s10 = int_to_ptr.vmem [resolvable:$true] %s42_s10 }
   0x4   :  { %s2738_s11 = scalar_lea.vmem %s43_s10, 10240  ;;  %p2743_p1 = scmp.lt.s32.totalorder %s43_s10, %s43_s10 }
   0x5   :  { %p2739_p0 = scmp.ne.s32.totalorder %s43_s10, %s2738_s11  ;;  %p2744_p2 = scmp.lt.s32.totalorder %s2738_s11, %s2738_s11 }
   0x7   :  { %p2745_p3 = por %p2744_p2, %p2743_p1 }
   0x9   :  { %p2746_p4 = pnand %p2745_p3, %p2739_p0 }
   0xb   :  { %2749 = shalt.err (!%p2746_p4)
}
   0xc   :  { %s2817_s12 = smov 128   ;;  %s2818_s13 = smov 8  }
   0xd   :  { %48 = dma.hbm_to_vmem [thread:$0]  %s2991_s5, 10240, %s43_s10, [#allocation6], %s2817_s12, %s2817_s12, %s2818_s13  }
   0xe   :  { %s2819_s16 = smov [#allocation2]  }
   0xf   :  { %s28_s17 = sshll.u32 %s2819_s16, 4  ;;  %s29_s17 = int_to_ptr.vmem [resolvable:$true] %s28_s17 }
  0x10   :  { %s2758_s18 = scalar_lea.vmem %s29_s17, 15360  ;;  %p2763_p6 = scmp.lt.s32.totalorder %s29_s17, %s29_s17 }
  0x11   :  { %p2759_p5 = scmp.ne.s32.totalorder %s29_s17, %s2758_s18  ;;  %p2764_p7 = scmp.lt.s32.totalorder %s2758_s18, %s2758_s18 }
  0x13   :  { %p2765_p8 = por %p2764_p7, %p2763_p6 }
  0x15   :  { %p2766_p9 = pnand %p2765_p8, %p2759_p5 }
  0x17   :  { %2769 = shalt.err (!%p2766_p9)
}
  0x18   :  { %s2820_s19 = smov 320   ;;  %s2821_s20 = smov 20  }
  0x19   :  { %34 = dma.hbm_to_vmem [thread:$0]  %s2989_s3, 15360, %s29_s17, [#allocation3], %s2820_s19, %s2820_s19, %s2821_s20  }
  0x1a   :  { %s2822_s23 = smov [#allocation7]  }
  0x1b   :  { %s56_s24 = sshll.u32 %s2822_s23, 4  ;;  %s57_s24 = int_to_ptr.vmem [resolvable:$true] %s56_s24 }
  0x1c   :  { %s2778_s5 = scalar_lea.vmem %s57_s24, 2048  ;;  %p2783_p11 = scmp.lt.s32.totalorder %s57_s24, %s57_s24 }
  0x1d   :  { %p2779_p10 = scmp.ne.s32.totalorder %s57_s24, %s2778_s5  ;;  %p2784_p12 = scmp.lt.s32.totalorder %s2778_s5, %s2778_s5 }
  0x1f   :  { %p2785_p13 = por %p2784_p12, %p2783_p11 }
  0x21   :  { %p2786_p0 = pnand %p2785_p13, %p2779_p10 }
  0x23   :  { %2789 = shalt.err (!%p2786_p0)
}
  0x24   :  { %s2823_s25 = smov 64   ;;  %s2824_s26 = smov 4  }
  0x25   :  { %62 = dma.hbm_to_vmem [thread:$0]  %s2993_s7, 2048, %s57_s24, [#allocation6], %s2823_s25, %s2823_s25, %s2824_s26  }
  0x26   :  { %2810 = dma.done.wait [#allocation3], 15360  }
  0x27   :  { %2811 = vsyncadd [#allocation3], 4294951936 }
  0x28   :  { %2812 = dma.done.wait [#allocation6], 12288  }
  0x29   :  { %2813 = vsyncadd [#allocation6], 4294955008  ;;  %vm135_vm0 = vcmask 1044480   ;;  %v2825_v0 = vmov 0.0   ;;  %vm2826_vm1 = vmmov 0   ;;  %v2827_v1 = vmov 0  }
  0x2a   :  { %2376 = vmatprep.subr.bf16.mxu1 %v2825_v0  ;;  %2380 = vmatprep.mubr.msk.bf16.mxu1 %vm2826_vm1, %v2825_v0  ;;  %vm136_vm2 = vcmask 1045504   ;;  %v2828_v2 = vmov 65535   ;;  %v2418_v5 = vld [vmem:[%s2987_s1 + $0x1c] ss:$12 sps:$4 sm:$0x3f]   ;;  %vm131_vm3 = vcmask 220160  }
  0x2b   :  { %180 = vmatprep.mubr.bf16.mxu0 %v2827_v1  ;;  %v137_v3 = vsel %vm135_vm0, 4294967295, %v2828_v2  ;;  %v2420_v7 = vld [vmem:[%s2987_s1 + $0x20] ss:$12 sps:$4 sm:$0x3f]   ;;  %v2422_v9 = vld [vmem:[%s2987_s1 + $0x4] ss:$12 sps:$4 sm:$0xff]  }
  0x2c   :  { %v138_v4 = vsel %vm136_vm2, %v137_v3, 0  ;;  %v2421_v8 = vld [vmem:[%s2987_s1 + $0x18] ss:$12 sps:$4 sm:$0x3f]   ;;  %v2424_v12 = vld [vmem:[%s2987_s1 + $0x8] ss:$12 sps:$4 sm:$0xff]  }
  0x2d   :  { %v143_v6 = vand.u32 %v2418_v5, %v138_v4  ;;  %v146_v10 = vand.u32 %v2420_v7, %v138_v4  ;;  %v140_v11 = vand.u32 %v2421_v8, %v138_v4  ;;  %v2425_v13 = vld [vmem:[%s2987_s1] ss:$12 sps:$4 sm:$0xff]   ;;  %v2428_v15 = vld [vmem:[#allocation2 + $0x11c] ss:$20 sps:$4 sm:$0xff]   ;;  %v2431_v18 = vld [vmem:[#allocation2 + $0xf4] ss:$20 sps:$4 sm:$0xff]   ;;  %v87_v4 = vlaneseq }
  0x2e   :  { %v75_v14 = vld [vmem:[%s2986_s0] sm:$0x3]  ;;  %v2426_v17 = vld [vmem:[#allocation2 + $0x118] ss:$20 sps:$4 sm:$0xff]   ;;  %v2429_v19 = vld [vmem:[#allocation2 + $0xf0] ss:$20 sps:$4 sm:$0xff]  }
  0x2f   :  { %160 = vmatprep.subr.bf16.mxu0 %v143_v6  ;;  %2377 = vmatpush3.bf16.msra.mxu1 %v146_v10  ;;  %v84_v16 = vpack.c.bf16 %v75_v14, %v75_v14  ;;  %v2434_v20 = vld [vmem:[#allocation2 + $0xcc] ss:$20 sps:$4 sm:$0xff]   ;;  %v2452_v22 = vld [vmem:[#allocation2 + $0x39c] ss:$20 sps:$4 sm:$0xff]   ;;  %v2437_v24 = vld [vmem:[#allocation2 + $0xa4] ss:$20 sps:$4 sm:$0xff]  }
  0x30   :  { %161 = vmatpush1.bf16.msra.mxu0 %v140_v11  ;;  %2378 = vmatprep.subr.bf16.mxu1 %v2825_v0  ;;  %v2450_v21 = vld [vmem:[#allocation2 + $0x398] ss:$20 sps:$4 sm:$0xff]   ;;  %v2432_v23 = vld [vmem:[#allocation2 + $0xc8] ss:$20 sps:$4 sm:$0xff]   ;;  %v2456_v26 = vld [vmem:[#allocation2 + $0x370] ss:$20 sps:$4 sm:$0xff]  }
  0x31   :  { %162 = vmatprep.subr.bf16.mxu0 %v2422_v9  ;;  %v2458_v25 = vld [vmem:[#allocation2 + $0x374] ss:$20 sps:$4 sm:$0xff]   ;;  %v2464_v28 = vld [vmem:[#allocation2 + $0x34c] ss:$20 sps:$4 sm:$0xff]   ;;  %v2440_v29 = vld [vmem:[#allocation2 + $0x7c] ss:$20 sps:$4 sm:$0xff]  }
  0x32   :  { %v2435_v27 = vld [vmem:[#allocation2 + $0xa0] ss:$20 sps:$4 sm:$0xff]   ;;  %v2462_v30 = vld [vmem:[#allocation2 + $0x348] ss:$20 sps:$4 sm:$0xff]   ;;  %v2470_v31 = vld [vmem:[#allocation2 + $0x324] ss:$20 sps:$4 sm:$0xff]  }
  0x33   :  { %2379 = vmatpush3.bf16.msra.mxu1 %v2424_v12  ;;  %v2438_v32 = vld [vmem:[#allocation2 + $0x78] ss:$20 sps:$4 sm:$0xff]   ;;  %v2443_v33 = vld [vmem:[#allocation2 + $0x54] ss:$20 sps:$4 sm:$0xff]   ;;  %v2476_v35 = vld [vmem:[#allocation2 + $0x2fc] ss:$20 sps:$4 sm:$0xff]  }
  0x34   :  { %163 = vmatpush1.bf16.msra.mxu0 %v2425_v13  ;;  %1071 = vmatprep.subr.bf16.mxu1 %v2452_v22  ;;  %v2468_v34 = vld [vmem:[#allocation2 + $0x320] ss:$20 sps:$4 sm:$0xff]   ;;  %v2441_v36 = vld [vmem:[#allocation2 + $0x50] ss:$20 sps:$4 sm:$0xff]   ;;  %v2444_v38 = vld [vmem:[#allocation2 + $0x28] ss:$20 sps:$4 sm:$0xff]  }
  0x35   :  { %1030 = vmatprep.subr.bf16.mxu0 %v2428_v15  ;;  %v2446_v37 = vld [vmem:[#allocation2 + $0x2c] ss:$20 sps:$4 sm:$0xff]   ;;  %v2449_v40 = vld [vmem:[#allocation2 + $0x4] ss:$20 sps:$4 sm:$0xff]   ;;  %v2482_v41 = vld [vmem:[#allocation2 + $0x2d4] ss:$20 sps:$4 sm:$0xff]  }
  0x36   :  { %2381 = vmatmul.mubr.msk.bf16.vlgmr.msra.gmra.mxu1 %vm131_vm3, %v84_v16  ;;  %v2474_v39 = vld [vmem:[#allocation2 + $0x2f8] ss:$20 sps:$4 sm:$0xff]   ;;  %v2480_v42 = vld [vmem:[#allocation2 + $0x2d0] ss:$20 sps:$4 sm:$0xff]   ;;  %v2447_v44 = vld [vmem:[#allocation2] ss:$20 sps:$4 sm:$0xff]  }
  0x37   :  { %2101 = vmatmul.mubr.msk.bf16.vlgmr.msra.gmra.mxu0 %vm131_vm3, %v84_v16  ;;  %1103 = vmatprep.mubr.bf16.mxu1 %v2827_v1  ;;  %v2488_v43 = vld [vmem:[#allocation2 + $0x2ac] ss:$20 sps:$4 sm:$0xff]   ;;  %v2455_v45 = vld [vmem:[#allocation2 + $0x25c] ss:$20 sps:$4 sm:$0xff]   ;;  %v2461_v48 = vld [vmem:[#allocation2 + $0x234] ss:$20 sps:$4 sm:$0xff]  }
  0x38   :  { %1031 = vmatpush1.bf16.msra.mxu0 %v2426_v17  ;;  %1072 = vmatpush1.bf16.msra.mxu1 %v2450_v21  ;;  %v2486_v46 = vld [vmem:[#allocation2 + $0x2a8] ss:$20 sps:$4 sm:$0xff]   ;;  %v2453_v47 = vld [vmem:[#allocation2 + $0x258] ss:$20 sps:$4 sm:$0xff]   ;;  %v2459_v49 = vld [vmem:[#allocation2 + $0x230] ss:$20 sps:$4 sm:$0xff]  }
  0x39   :  { %1032 = vmatprep.subr.bf16.mxu0 %v2431_v18  ;;  %1073 = vmatprep.subr.bf16.mxu1 %v2458_v25  ;;  %v2467_v50 = vld [vmem:[#allocation2 + $0x20c] ss:$20 sps:$4 sm:$0xff]   ;;  %v2465_v51 = vld [vmem:[#allocation2 + $0x208] ss:$20 sps:$4 sm:$0xff]   ;;  %v2473_v52 = vld [vmem:[#allocation2 + $0x1e4] ss:$20 sps:$4 sm:$0xff]  }
  0x3a   :  { %v2471_v53 = vld [vmem:[#allocation2 + $0x1e0] ss:$20 sps:$4 sm:$0xff]   ;;  %v2479_v54 = vld [vmem:[#allocation2 + $0x1bc] ss:$20 sps:$4 sm:$0xff]   ;;  %v2477_v55 = vld [vmem:[#allocation2 + $0x1b8] ss:$20 sps:$4 sm:$0xff]  }
  0x3b   :  { %v2485_v56 = vld [vmem:[#allocation2 + $0x194] ss:$20 sps:$4 sm:$0xff]   ;;  %v2483_v57 = vld [vmem:[#allocation2 + $0x190] ss:$20 sps:$4 sm:$0xff]   ;;  %v2491_v58 = vld [vmem:[#allocation2 + $0x16c] ss:$20 sps:$4 sm:$0xff]  }
  0x3c   :  { %1033 = vmatpush1.bf16.msra.mxu0 %v2429_v19  ;;  %1074 = vmatpush1.bf16.msra.mxu1 %v2456_v26  ;;  %v2494_v59 = vld [vmem:[#allocation2 + $0x284] ss:$20 sps:$4 sm:$0xff]   ;;  %v2489_v60 = vld [vmem:[#allocation2 + $0x168] ss:$20 sps:$4 sm:$0xff]   ;;  %v2492_v61 = vld [vmem:[#allocation2 + $0x280] ss:$20 sps:$4 sm:$0xff]  }
  0x3d   :  { %1034 = vmatprep.subr.bf16.mxu0 %v2434_v20  ;;  %1075 = vmatprep.subr.bf16.mxu1 %v2464_v28  ;;  %v2497_v62 = vld [vmem:[#allocation2 + $0x144] ss:$20 sps:$4 sm:$0xff]   ;;  %v2495_v2 = vld [vmem:[#allocation2 + $0x140] ss:$20 sps:$4 sm:$0xff]   ;;  %v2916_v5 = vshrl.u32 %v87_v4, 7  ;;  %s2829_s23 = smov [#allocation8]  }
  0x3e   :  { %v2500_v63 = vld [vmem:[#allocation2 + $0x124] ss:$20 sps:$4 sm:$0xff]   ;;  %v85_v8 = vld [vmem:[%s2988_s2] sm:$0x7]  ;;  %s2085_s24 = sshll.u32 %s2829_s23, 4  ;;  %s2086_s24 = int_to_ptr.vmem [resolvable:$true] %s2085_s24 }
  0x3f   :  { %v2506_v3 = vld [vmem:[#allocation2 + $0x3a4] ss:$20 sps:$4 sm:$0xff]   ;;  %v97_v6 = vsub.s32 2, %v2916_v5  ;;  %v2920_v7 = vsub.s32 0, %v2916_v5  ;;  %v2926_v9 = vsub.s32 1, %v2916_v5  ;;  %s2790_s5 = scalar_lea.vmem %s2086_s24, 32  ;;  %p2795_p2 = scmp.lt.s32.totalorder %s2086_s24, %s2086_s24 }
  0x40   :  { %1035 = vmatpush1.bf16.msra.mxu0 %v2432_v23  ;;  %1076 = vmatpush1.bf16.msra.mxu1 %v2462_v30  ;;  %v2498_v23 = vld [vmem:[#allocation2 + $0x120] ss:$20 sps:$4 sm:$0xff]   ;;  %p2791_p1 = scmp.ne.s32.totalorder %s2086_s24, %s2790_s5  ;;  %p2796_p3 = scmp.lt.s32.totalorder %s2790_s5, %s2790_s5 }
  0x41   :  { %1036 = vmatprep.subr.bf16.mxu0 %v2437_v24  ;;  %1077 = vmatprep.subr.bf16.mxu1 %v2470_v31  ;;  %v98_v10 = vrot.slane %v85_v8, %v97_v6  ;;  %v90_v11 = vrot.slane %v85_v8, %v2920_v7  ;;  %v94_v12 = vrot.slane %v85_v8, %v2926_v9  ;;  %v2557_v4 = vld [vmem:[#allocation2 + $0x240] ss:$20 sps:$4 sm:$0xff]  }
  0x42   :  { %v2556_v8 = vld [vmem:[#allocation2 + $0x214] ss:$20 sps:$4 sm:$0xff]   ;;  %p2797_p4 = por %p2796_p3, %p2795_p2 }
  0x44   :  { %1037 = vmatpush1.bf16.msra.mxu0 %v2435_v27  ;;  %1078 = vmatpush1.bf16.msra.mxu1 %v2468_v34  ;;  %v2503_v27 = vld [vmem:[#allocation2 + $0xfc] ss:$20 sps:$4 sm:$0xff]   ;;  %p2798_p5 = pnand %p2797_p4, %p2791_p1 }
  0x45   :  { %1038 = vmatprep.subr.bf16.mxu0 %v2440_v29  ;;  %1079 = vmatprep.subr.bf16.mxu1 %v2476_v35  ;;  %v2512_v34 = vld [vmem:[#allocation2 + $0x37c] ss:$20 sps:$4 sm:$0xff]   ;;  %v2509_v35 = vld [vmem:[#allocation2 + $0xd4] ss:$20 sps:$4 sm:$0xff]  }
  0x48   :  { %1039 = vmatpush1.bf16.msra.mxu0 %v2438_v32  ;;  %1080 = vmatpush1.bf16.msra.mxu1 %v2474_v39  ;;  %v2504_v32 = vld [vmem:[#allocation2 + $0x3a0] ss:$20 sps:$4 sm:$0xff]  }
  0x49   :  { %1040 = vmatprep.subr.bf16.mxu0 %v2443_v33  ;;  %1081 = vmatprep.subr.bf16.mxu1 %v2482_v41  ;;  %v2501_v33 = vld [vmem:[#allocation2 + $0xf8] ss:$20 sps:$4 sm:$0xff]   ;;  %v2513_v41 = vld [vmem:[#allocation2 + $0xa8] ss:$20 sps:$4 sm:$0xff]  }
  0x4a   :  { %v2515_v39 = vld [vmem:[#allocation2 + $0xac] ss:$20 sps:$4 sm:$0xff]  }
  0x4c   :  { %1041 = vmatpush1.bf16.msra.mxu0 %v2441_v36  ;;  %1082 = vmatpush1.bf16.msra.mxu1 %v2480_v42  ;;  %v2510_v36 = vld [vmem:[#allocation2 + $0x378] ss:$20 sps:$4 sm:$0xff]  }
  0x4d   :  { %1042 = vmatprep.subr.bf16.mxu0 %v2446_v37  ;;  %1083 = vmatprep.subr.bf16.mxu1 %v2488_v43  ;;  %v2507_v37 = vld [vmem:[#allocation2 + $0xd0] ss:$20 sps:$4 sm:$0xff]   ;;  %v2524_v42 = vld [vmem:[#allocation2 + $0x32c] ss:$20 sps:$4 sm:$0xff]  }
  0x4e   :  { %v2521_v43 = vld [vmem:[#allocation2 + $0x84] ss:$20 sps:$4 sm:$0xff]  }
  0x50   :  { %1043 = vmatpush1.bf16.msra.mxu0 %v2444_v38  ;;  %1084 = vmatpush1.bf16.msra.mxu1 %v2486_v46  ;;  %v2518_v38 = vld [vmem:[#allocation2 + $0x354] ss:$20 sps:$4 sm:$0xff]   ;;  %v2530_v46 = vld [vmem:[#allocation2 + $0x304] ss:$20 sps:$4 sm:$0xff]  }
  0x51   :  { %1044 = vmatprep.subr.bf16.mxu0 %v2449_v40  ;;  %1085 = vmatprep.subr.bf16.mxu1 %v2494_v59  ;;  %v2516_v40 = vld [vmem:[#allocation2 + $0x350] ss:$20 sps:$4 sm:$0xff]  }
  0x52   :  { %v2545_v59 = vld [vmem:[#allocation2 + $0x264] ss:$20 sps:$4 sm:$0xff]  }
  0x54   :  { %1045 = vmatpush1.bf16.msra.mxu0 %v2447_v44  ;;  %1086 = vmatpush1.bf16.msra.mxu1 %v2492_v61  ;;  %v2522_v44 = vld [vmem:[#allocation2 + $0x328] ss:$20 sps:$4 sm:$0xff]   ;;  %v2543_v61 = vld [vmem:[#allocation2 + $0x260] ss:$20 sps:$4 sm:$0xff]  }
  0x55   :  { %1046 = vmatprep.subr.bf16.mxu0 %v2455_v45  ;;  %1112 = vmatprep.subr.bf16.mxu1 %v2500_v63  ;;  %v2519_v45 = vld [vmem:[#allocation2 + $0x80] ss:$20 sps:$4 sm:$0xff]   ;;  %v2551_v63 = vld [vmem:[#allocation2 + $0x23c] ss:$20 sps:$4 sm:$0xff]  }
  0x58   :  { %1047 = vmatpush2.bf16.msra.mxu0 %v2453_v47  ;;  %v2527_v47 = vld [vmem:[#allocation2 + $0x5c] ss:$20 sps:$4 sm:$0xff]  }
  0x59   :  { %1048 = vmatprep.subr.bf16.mxu0 %v2461_v48  ;;  %v2528_v48 = vld [vmem:[#allocation2 + $0x300] ss:$20 sps:$4 sm:$0xff]  }
  0x5c   :  { %1049 = vmatpush2.bf16.msra.mxu0 %v2459_v49  ;;  %v2525_v49 = vld [vmem:[#allocation2 + $0x58] ss:$20 sps:$4 sm:$0xff]  }
  0x5d   :  { %1050 = vmatprep.subr.bf16.mxu0 %v2467_v50  ;;  %v2536_v50 = vld [vmem:[#allocation2 + $0x2dc] ss:$20 sps:$4 sm:$0xff]  }
  0x60   :  { %1051 = vmatpush2.bf16.msra.mxu0 %v2465_v51  ;;  %v2533_v51 = vld [vmem:[#allocation2 + $0x34] ss:$20 sps:$4 sm:$0xff]  }
  0x61   :  { %1052 = vmatprep.subr.bf16.mxu0 %v2473_v52  ;;  %v2534_v52 = vld [vmem:[#allocation2 + $0x2d8] ss:$20 sps:$4 sm:$0xff]  }
  0x64   :  { %1053 = vmatpush2.bf16.msra.mxu0 %v2471_v53  ;;  %v2531_v53 = vld [vmem:[#allocation2 + $0x30] ss:$20 sps:$4 sm:$0xff]  }
  0x65   :  { %1054 = vmatprep.subr.bf16.mxu0 %v2479_v54  ;;  %v2542_v54 = vld [vmem:[#allocation2 + $0x2b4] ss:$20 sps:$4 sm:$0xff]  }
  0x68   :  { %1055 = vmatpush2.bf16.msra.mxu0 %v2477_v55  ;;  %v2539_v55 = vld [vmem:[#allocation2 + $0xc] ss:$20 sps:$4 sm:$0xff]  }
  0x69   :  { %1056 = vmatprep.subr.bf16.mxu0 %v2485_v56  ;;  %v2540_v56 = vld [vmem:[#allocation2 + $0x2b0] ss:$20 sps:$4 sm:$0xff]  }
  0x6c   :  { %1057 = vmatpush2.bf16.msra.mxu0 %v2483_v57  ;;  %v2537_v57 = vld [vmem:[#allocation2 + $0x8] ss:$20 sps:$4 sm:$0xff]  }
  0x6d   :  { %1058 = vmatprep.subr.bf16.mxu0 %v2491_v58  ;;  %v2548_v58 = vld [vmem:[#allocation2 + $0x28c] ss:$20 sps:$4 sm:$0xff]  }
  0x70   :  { %1059 = vmatpush2.bf16.msra.mxu0 %v2489_v60  ;;  %v2546_v60 = vld [vmem:[#allocation2 + $0x288] ss:$20 sps:$4 sm:$0xff]  }
  0x71   :  { %1060 = vmatprep.subr.bf16.mxu0 %v2497_v62  ;;  %v2552_v62 = vld [vmem:[#allocation2 + $0x268] ss:$20 sps:$4 sm:$0xff]  }
  0x74   :  { %1061 = vmatpush2.bf16.msra.mxu0 %v2495_v2  ;;  %v2553_v2 = vld [vmem:[#allocation2 + $0x128] ss:$20 sps:$4 sm:$0xff]  }
  0x75   :  { %1153 = vmatprep.subr.bf16.mxu0 %v2506_v3  ;;  %v2549_v3 = vld [vmem:[#allocation2 + $0x238] ss:$20 sps:$4 sm:$0xff]  }
  0xf6   :  { %v223_v13 = vpop.f32.mrf.mxu1 }
  0xf7   :  { %v182_v14 = vpop.f32.mrf.mxu0  ;;  %v224_v15 = vadd.f32 %v223_v13, %v98_v10  ;;  %v2558_v10 = vld [vmem:[#allocation2 + $0x100] ss:$20 sps:$4 sm:$0xff]  }
  0xf8   :  { %v183_v16 = vadd.f32 %v182_v14, %v90_v11  ;;  %v2382_v17 = vpop.f32.mrf.mxu1  ;;  %v2554_v11 = vld [vmem:[#allocation2 + $0x210] ss:$20 sps:$4 sm:$0xff]   ;;  %v2561_v13 = vld [vmem:[#allocation2 + $0x1ec] ss:$20 sps:$4 sm:$0xff]  }
  0xf9   :  { %v184_v18 = vpop.f32.mrf.mxu0  ;;  %v231_v19 = vmax.f32 %v224_v15, 0.0  ;;  %v2563_v14 = vld [vmem:[#allocation2 + $0xd8] ss:$20 sps:$4 sm:$0xff]   ;;  %v2559_v15 = vld [vmem:[#allocation2 + $0x1e8] ss:$20 sps:$4 sm:$0xff]  }
  0xfa   :  { %v229_v20 = vmax.f32 %v183_v16, 0.0  ;;  %v185_v21 = vadd.f32 %v184_v18, %v94_v12  ;;  %v226_v22 = vpop.f32.mrf.mxu1  ;;  %v2562_v12 = vld [vmem:[#allocation2 + $0x218] ss:$20 sps:$4 sm:$0xff]   ;;  %v2567_v16 = vld [vmem:[#allocation2 + $0x1f0] ss:$20 sps:$4 sm:$0xff]  }
  0xfb   :  { %v186_v24 = vpop.f32.mrf.mxu0  ;;  %v2932_v25 = vpack.c.bf16 %v231_v19, %v231_v19  ;;  %v2566_v17 = vld [vmem:[#allocation2 + $0x1c4] ss:$20 sps:$4 sm:$0xff]   ;;  %v2564_v19 = vld [vmem:[#allocation2 + $0x1c0] ss:$20 sps:$4 sm:$0xff]   ;;  %v2573_v22 = vld [vmem:[#allocation2 + $0x88] ss:$20 sps:$4 sm:$0xff]  }
  0xfc   :  { %v230_v26 = vmax.f32 %v185_v21, 0.0  ;;  %v2934_v28 = vpack.c.bf16 %v229_v20, %v229_v20  ;;  %v2383_v29 = vpop.f32.mrf.mxu1  ;;  %v2568_v18 = vld [vmem:[#allocation2 + $0xb0] ss:$20 sps:$4 sm:$0xff]   ;;  %v2572_v20 = vld [vmem:[#allocation2 + $0x1c8] ss:$20 sps:$4 sm:$0xff]  }
  0xfd   :  { %v187_v30 = vpop.f32.mrf.mxu0  ;;  %1104 = vmatmul.mubr.bf16.vlgmr.msra.gmra.mxu1 %v2932_v25  ;;  %v2571_v21 = vld [vmem:[#allocation2 + $0x19c] ss:$20 sps:$4 sm:$0xff]   ;;  %v2577_v24 = vld [vmem:[#allocation2 + $0x1a0] ss:$20 sps:$4 sm:$0xff]  }
  0xfe   :  { %v2936_v31 = vpack.c.bf16 %v230_v26, %v230_v26  ;;  %1113 = vmatpush1.bf16.msra.mxu1 %v2498_v23  ;;  %v2569_v23 = vld [vmem:[#allocation2 + $0x198] ss:$20 sps:$4 sm:$0xff]   ;;  %v2576_v26 = vld [vmem:[#allocation2 + $0x174] ss:$20 sps:$4 sm:$0xff]   ;;  %v2574_v29 = vld [vmem:[#allocation2 + $0x170] ss:$20 sps:$4 sm:$0xff]  }
  0xff   :  { %1114 = vmatprep.subr.bf16.mxu1 %v2503_v27  ;;  %v2578_v27 = vld [vmem:[#allocation2 + $0x60] ss:$20 sps:$4 sm:$0xff]   ;;  %v2582_v30 = vld [vmem:[#allocation2 + $0x178] ss:$20 sps:$4 sm:$0xff]  }
 0x100   :  { %1062 = vmatprep.mubr.bf16.mxu0 %v2936_v31  ;;  %1144 = vmatprep.mubr.bf16.mxu1 %v2936_v31 }
 0x101   :  { %1063 = vmatmul.mubr.bf16.vlgmr.msra.gmra.mxu0 %v2934_v28 }
 0x102   :  { %1154 = vmatpush1.bf16.msra.mxu0 %v2504_v32  ;;  %1185 = vmatprep.mubr.bf16.mxu0 %v2827_v1  ;;  %v2583_v32 = vld [vmem:[#allocation2 + $0x38] ss:$20 sps:$4 sm:$0xff]  }
 0x103   :  { %1115 = vmatpush1.bf16.msra.mxu1 %v2501_v33  ;;  %1155 = vmatprep.subr.bf16.mxu0 %v2512_v34  ;;  %v2579_v33 = vld [vmem:[#allocation2 + $0x148] ss:$20 sps:$4 sm:$0xff]   ;;  %v2584_v34 = vld [vmem:[#allocation2 + $0x150] ss:$20 sps:$4 sm:$0xff]  }
 0x104   :  { %1116 = vmatprep.subr.bf16.mxu1 %v2509_v35  ;;  %v2585_v35 = vld [vmem:[#allocation2 + $0x10] ss:$20 sps:$4 sm:$0xff]  }
 0x106   :  { %1156 = vmatpush1.bf16.msra.mxu0 %v2510_v36  ;;  %v2586_v36 = vld [vmem:[#allocation2 + $0x3a8] ss:$20 sps:$4 sm:$0xff]  }
 0x107   :  { %1117 = vmatpush1.bf16.msra.mxu1 %v2507_v37  ;;  %1157 = vmatprep.subr.bf16.mxu0 %v2518_v38  ;;  %v2596_v37 = vld [vmem:[#allocation5 + $0x74] ss:$8 sps:$4 sm:$0xff]   ;;  %v2594_v38 = vld [vmem:[#allocation5 + $0x70] ss:$8 sps:$4 sm:$0xff]  }
 0x108   :  { %1118 = vmatprep.subr.bf16.mxu1 %v2515_v39  ;;  %v2587_v39 = vld [vmem:[#allocation2 + $0x380] ss:$20 sps:$4 sm:$0xff]  }
 0x10a   :  { %1158 = vmatpush1.bf16.msra.mxu0 %v2516_v40  ;;  %v2599_v40 = vld [vmem:[#allocation5 + $0x64] ss:$8 sps:$4 sm:$0xff]  }
 0x10b   :  { %1119 = vmatpush1.bf16.msra.mxu1 %v2513_v41  ;;  %1159 = vmatprep.subr.bf16.mxu0 %v2524_v42  ;;  %v2597_v41 = vld [vmem:[#allocation5 + $0x60] ss:$8 sps:$4 sm:$0xff]   ;;  %v2588_v42 = vld [vmem:[#allocation2 + $0x358] ss:$20 sps:$4 sm:$0xff]  }
 0x10c   :  { %1120 = vmatprep.subr.bf16.mxu1 %v2521_v43  ;;  %v2602_v43 = vld [vmem:[#allocation5 + $0x54] ss:$8 sps:$4 sm:$0xff]  }
 0x10e   :  { %1160 = vmatpush1.bf16.msra.mxu0 %v2522_v44  ;;  %v2600_v44 = vld [vmem:[#allocation5 + $0x50] ss:$8 sps:$4 sm:$0xff]  }
 0x10f   :  { %1121 = vmatpush1.bf16.msra.mxu1 %v2519_v45  ;;  %1161 = vmatprep.subr.bf16.mxu0 %v2530_v46  ;;  %v2589_v45 = vld [vmem:[#allocation2 + $0x330] ss:$20 sps:$4 sm:$0xff]  }
 0x110   :  { %1122 = vmatprep.subr.bf16.mxu1 %v2527_v47  ;;  %v2605_v46 = vld [vmem:[#allocation5 + $0x44] ss:$8 sps:$4 sm:$0xff]   ;;  %v2603_v47 = vld [vmem:[#allocation5 + $0x40] ss:$8 sps:$4 sm:$0xff]  }
 0x112   :  { %1162 = vmatpush1.bf16.msra.mxu0 %v2528_v48  ;;  %v2608_v48 = vld [vmem:[#allocation5 + $0x34] ss:$8 sps:$4 sm:$0xff]  }
 0x113   :  { %1123 = vmatpush1.bf16.msra.mxu1 %v2525_v49  ;;  %1163 = vmatprep.subr.bf16.mxu0 %v2536_v50  ;;  %v2606_v49 = vld [vmem:[#allocation5 + $0x30] ss:$8 sps:$4 sm:$0xff]   ;;  %v2591_v50 = vld [vmem:[#allocation2 + $0x2e0] ss:$20 sps:$4 sm:$0xff]  }
 0x114   :  { %1124 = vmatprep.subr.bf16.mxu1 %v2533_v51  ;;  %v2611_v51 = vld [vmem:[#allocation5 + $0x24] ss:$8 sps:$4 sm:$0xff]  }
 0x116   :  { %1164 = vmatpush1.bf16.msra.mxu0 %v2534_v52  ;;  %v2609_v52 = vld [vmem:[#allocation5 + $0x20] ss:$8 sps:$4 sm:$0xff]  }
 0x117   :  { %1125 = vmatpush1.bf16.msra.mxu1 %v2531_v53  ;;  %1165 = vmatprep.subr.bf16.mxu0 %v2542_v54  ;;  %v2592_v53 = vld [vmem:[#allocation2 + $0x2b8] ss:$20 sps:$4 sm:$0xff]   ;;  %v2614_v54 = vld [vmem:[#allocation5 + $0x14] ss:$8 sps:$4 sm:$0xff]  }
 0x118   :  { %1126 = vmatprep.subr.bf16.mxu1 %v2539_v55  ;;  %v2612_v55 = vld [vmem:[#allocation5 + $0x10] ss:$8 sps:$4 sm:$0xff]  }
 0x11a   :  { %1166 = vmatpush1.bf16.msra.mxu0 %v2540_v56  ;;  %v2593_v56 = vld [vmem:[#allocation2 + $0x290] ss:$20 sps:$4 sm:$0xff]  }
 0x11b   :  { %1127 = vmatpush1.bf16.msra.mxu1 %v2537_v57  ;;  %1167 = vmatprep.subr.bf16.mxu0 %v2548_v58  ;;  %v2617_v57 = vld [vmem:[#allocation5 + $0x4] ss:$8 sps:$4 sm:$0xff]   ;;  %v2641_v58 = vld [vmem:[#allocation5 + $0x174] ss:$8 sps:$4 sm:$0xff]  }
 0x11c   :  { %1128 = vmatprep.subr.bf16.mxu1 %v2545_v59  ;;  %v2615_v59 = vld [vmem:[#allocation5] ss:$8 sps:$4 sm:$0xff]  }
 0x11e   :  { %1168 = vmatpush1.bf16.msra.mxu0 %v2546_v60  ;;  %v2620_v60 = vld [vmem:[#allocation5 + $0xf4] ss:$8 sps:$4 sm:$0xff]  }
 0x11f   :  { %1129 = vmatpush2.bf16.msra.mxu1 %v2543_v61  ;;  %2323 = vmatprep.subr.bf16.mxu0 %v2552_v62  ;;  %v2639_v61 = vld [vmem:[#allocation5 + $0x170] ss:$8 sps:$4 sm:$0xff]   ;;  %v2647_v62 = vld [vmem:[#allocation5 + $0x164] ss:$8 sps:$4 sm:$0xff]  }
 0x120   :  { %1130 = vmatprep.subr.bf16.mxu1 %v2551_v63  ;;  %v2618_v63 = vld [vmem:[#allocation5 + $0xf0] ss:$8 sps:$4 sm:$0xff]  }
 0x121   :  { %1186 = vmatmul.mubr.bf16.vlgmr.msra.gmra.mxu0 %v2932_v25 }
 0x122   :  { %2324 = vmatpush3.bf16.msra.mxu0 %v2553_v2  ;;  %1226 = vmatprep.mubr.bf16.mxu0 %v2936_v31  ;;  %v2581_v31 = vld [vmem:[#allocation2 + $0x14c] ss:$20 sps:$4 sm:$0xff]  }
 0x123   :  { %1131 = vmatpush2.bf16.msra.mxu1 %v2549_v3  ;;  %2325 = vmatprep.subr.bf16.mxu0 %v2557_v4  ;;  %v2623_v2 = vld [vmem:[#allocation5 + $0xe4] ss:$8 sps:$4 sm:$0xff]   ;;  %v2645_v3 = vld [vmem:[#allocation5 + $0x160] ss:$8 sps:$4 sm:$0xff]   ;;  %v2650_v4 = vld [vmem:[#allocation5 + $0x154] ss:$8 sps:$4 sm:$0xff]  }
 0x124   :  { %1132 = vmatprep.subr.bf16.mxu1 %v2556_v8  ;;  %v2626_v8 = vld [vmem:[#allocation5 + $0xd4] ss:$8 sps:$4 sm:$0xff]  }
 0x126   :  { %2326 = vmatpush3.bf16.msra.mxu0 %v2558_v10  ;;  %v2648_v10 = vld [vmem:[#allocation5 + $0x150] ss:$8 sps:$4 sm:$0xff]  }
 0x127   :  { %1133 = vmatpush2.bf16.msra.mxu1 %v2554_v11  ;;  %2327 = vmatprep.subr.bf16.mxu0 %v2562_v12  ;;  %v2653_v11 = vld [vmem:[#allocation5 + $0x144] ss:$8 sps:$4 sm:$0xff]   ;;  %v2624_v12 = vld [vmem:[#allocation5 + $0xd0] ss:$8 sps:$4 sm:$0xff]  }
 0x128   :  { %1134 = vmatprep.subr.bf16.mxu1 %v2561_v13  ;;  %v2651_v13 = vld [vmem:[#allocation5 + $0x140] ss:$8 sps:$4 sm:$0xff]  }
 0x12a   :  { %2328 = vmatpush3.bf16.msra.mxu0 %v2563_v14  ;;  %v2656_v14 = vld [vmem:[#allocation5 + $0x134] ss:$8 sps:$4 sm:$0xff]  }
 0x12b   :  { %1135 = vmatpush2.bf16.msra.mxu1 %v2559_v15  ;;  %2329 = vmatprep.subr.bf16.mxu0 %v2567_v16  ;;  %v2627_v15 = vld [vmem:[#allocation5 + $0xc0] ss:$8 sps:$4 sm:$0xff]   ;;  %v2632_v16 = vld [vmem:[#allocation5 + $0xb4] ss:$8 sps:$4 sm:$0xff]  }
 0x12c   :  { %1136 = vmatprep.subr.bf16.mxu1 %v2566_v17  ;;  %v2654_v17 = vld [vmem:[#allocation5 + $0x130] ss:$8 sps:$4 sm:$0xff]  }
 0x12e   :  { %2330 = vmatpush3.bf16.msra.mxu0 %v2568_v18  ;;  %v2659_v18 = vld [vmem:[#allocation5 + $0x124] ss:$8 sps:$4 sm:$0xff]  }
 0x12f   :  { %1137 = vmatpush2.bf16.msra.mxu1 %v2564_v19  ;;  %2331 = vmatprep.subr.bf16.mxu0 %v2572_v20  ;;  %v2630_v19 = vld [vmem:[#allocation5 + $0xb0] ss:$8 sps:$4 sm:$0xff]   ;;  %v2635_v20 = vld [vmem:[#allocation5 + $0xa4] ss:$8 sps:$4 sm:$0xff]  }
 0x130   :  { %1138 = vmatprep.subr.bf16.mxu1 %v2571_v21  ;;  %v2657_v21 = vld [vmem:[#allocation5 + $0x120] ss:$8 sps:$4 sm:$0xff]  }
 0x132   :  { %2332 = vmatpush3.bf16.msra.mxu0 %v2573_v22  ;;  %v2662_v22 = vld [vmem:[#allocation5 + $0x114] ss:$8 sps:$4 sm:$0xff]  }
 0x133   :  { %1139 = vmatpush2.bf16.msra.mxu1 %v2569_v23  ;;  %2333 = vmatprep.subr.bf16.mxu0 %v2577_v24  ;;  %v2633_v23 = vld [vmem:[#allocation5 + $0xa0] ss:$8 sps:$4 sm:$0xff]   ;;  %v2638_v24 = vld [vmem:[#allocation5 + $0x94] ss:$8 sps:$4 sm:$0xff]  }
 0x134   :  { %1140 = vmatprep.subr.bf16.mxu1 %v2576_v26  ;;  %v2660_v26 = vld [vmem:[#allocation5 + $0x110] ss:$8 sps:$4 sm:$0xff]  }
 0x136   :  { %2334 = vmatpush3.bf16.msra.mxu0 %v2578_v27  ;;  %v2665_v27 = vld [vmem:[#allocation5 + $0x104] ss:$8 sps:$4 sm:$0xff]  }
 0x137   :  { %1141 = vmatpush2.bf16.msra.mxu1 %v2574_v29  ;;  %2335 = vmatprep.subr.bf16.mxu0 %v2582_v30  ;;  %v2636_v29 = vld [vmem:[#allocation5 + $0x90] ss:$8 sps:$4 sm:$0xff]   ;;  %v2644_v30 = vld [vmem:[#allocation5 + $0x84] ss:$8 sps:$4 sm:$0xff]  }
 0x138   :  { %1142 = vmatprep.subr.bf16.mxu1 %v2581_v31  ;;  %v2663_v31 = vld [vmem:[#allocation5 + $0x100] ss:$8 sps:$4 sm:$0xff]  }
 0x13a   :  { %2336 = vmatpush3.bf16.msra.mxu0 %v2583_v32  ;;  %v2668_v32 = vld [vmem:[#allocation5 + $0x1f4] ss:$8 sps:$4 sm:$0xff]  }
 0x13b   :  { %1143 = vmatpush2.bf16.msra.mxu1 %v2579_v33  ;;  %2337 = vmatprep.subr.bf16.mxu0 %v2584_v34  ;;  %v2642_v33 = vld [vmem:[#allocation5 + $0x80] ss:$8 sps:$4 sm:$0xff]   ;;  %v2666_v34 = vld [vmem:[#allocation5 + $0x1f0] ss:$8 sps:$4 sm:$0xff]  }
 0x13c   :  { %2384 = vmatprep.subr.bf16.mxu1 %v2825_v0 }
 0x13e   :  { %1145 = vmatmul.mubr.bf16.vlgmr.msra.gmra.mxu1 %v2934_v28  ;;  %2338 = vmatpush3.bf16.msra.mxu0 %v2585_v35  ;;  %v2671_v35 = vld [vmem:[#allocation5 + $0x1e4] ss:$8 sps:$4 sm:$0xff]  }
 0x13f   :  { %2385 = vmatpush3.bf16.msra.mxu1 %v2586_v36  ;;  %2400 = vmatprep.mubr.msk.bf16.mxu1 %vm2826_vm1, %v2825_v0  ;;  %v2669_v36 = vld [vmem:[#allocation5 + $0x1e0] ss:$8 sps:$4 sm:$0xff]  }
 0x140   :  { %2386 = vmatprep.subr.bf16.mxu1 %v2825_v0  ;;  %1776 = vmatprep.subr.bf16.mxu0 %v2596_v37  ;;  %v2674_v37 = vld [vmem:[#allocation5 + $0x1d4] ss:$8 sps:$4 sm:$0xff]  }
 0x141   :  { %1227 = vmatmul.mubr.bf16.vlgmr.msra.gmra.mxu0 %v2934_v28  ;;  %v2590_v28 = vld [vmem:[#allocation2 + $0x308] ss:$20 sps:$4 sm:$0xff]  }
 0x142   :  { %1777 = vmatpush1.bf16.msra.mxu0 %v2594_v38  ;;  %v2672_v38 = vld [vmem:[#allocation5 + $0x1d0] ss:$8 sps:$4 sm:$0xff]  }
 0x143   :  { %2387 = vmatpush3.bf16.msra.mxu1 %v2587_v39  ;;  %1778 = vmatprep.subr.bf16.mxu0 %v2599_v40  ;;  %v2689_v39 = vld [vmem:[#allocation5 + $0x274] ss:$8 sps:$4 sm:$0xff]   ;;  %v2677_v40 = vld [vmem:[#allocation5 + $0x1c4] ss:$8 sps:$4 sm:$0xff]  }
 0x144   :  { %2388 = vmatprep.subr.bf16.mxu1 %v2825_v0 }
 0x146   :  { %1779 = vmatpush1.bf16.msra.mxu0 %v2597_v41  ;;  %v2675_v41 = vld [vmem:[#allocation5 + $0x1c0] ss:$8 sps:$4 sm:$0xff]  }
 0x147   :  { %2389 = vmatpush3.bf16.msra.mxu1 %v2588_v42  ;;  %1780 = vmatprep.subr.bf16.mxu0 %v2602_v43  ;;  %v2680_v42 = vld [vmem:[#allocation5 + $0x1b4] ss:$8 sps:$4 sm:$0xff]   ;;  %v2678_v43 = vld [vmem:[#allocation5 + $0x1b0] ss:$8 sps:$4 sm:$0xff]  }
 0x148   :  { %2390 = vmatprep.subr.bf16.mxu1 %v2825_v0 }
 0x14a   :  { %1781 = vmatpush1.bf16.msra.mxu0 %v2600_v44  ;;  %v2683_v44 = vld [vmem:[#allocation5 + $0x1a4] ss:$8 sps:$4 sm:$0xff]  }
 0x14b   :  { %2391 = vmatpush3.bf16.msra.mxu1 %v2589_v45  ;;  %1782 = vmatprep.subr.bf16.mxu0 %v2605_v46  ;;  %v2681_v45 = vld [vmem:[#allocation5 + $0x1a0] ss:$8 sps:$4 sm:$0xff]   ;;  %v2686_v46 = vld [vmem:[#allocation5 + $0x194] ss:$8 sps:$4 sm:$0xff]  }
 0x14c   :  { %2392 = vmatprep.subr.bf16.mxu1 %v2825_v0 }
 0x14e   :  { %1783 = vmatpush1.bf16.msra.mxu0 %v2603_v47  ;;  %v2684_v47 = vld [vmem:[#allocation5 + $0x190] ss:$8 sps:$4 sm:$0xff]  }
 0x14f   :  { %2393 = vmatpush3.bf16.msra.mxu1 %v2590_v28  ;;  %1784 = vmatprep.subr.bf16.mxu0 %v2608_v48  ;;  %v2692_v28 = vld [vmem:[#allocation5 + $0x184] ss:$8 sps:$4 sm:$0xff]   ;;  %v2690_v48 = vld [vmem:[#allocation5 + $0x180] ss:$8 sps:$4 sm:$0xff]  }
 0x150   :  { %2394 = vmatprep.subr.bf16.mxu1 %v2825_v0 }
 0x152   :  { %1785 = vmatpush1.bf16.msra.mxu0 %v2606_v49  ;;  %v2961_v49 = vld [vmem:[%s2990_s4] sm:$0x1f] }
 0x153   :  { %2395 = vmatpush3.bf16.msra.mxu1 %v2591_v50  ;;  %1786 = vmatprep.subr.bf16.mxu0 %v2611_v51  ;;  %v384_v51 = vrot.slane %v2961_v49, %v2920_v7 }
 0x154   :  { %2396 = vmatprep.subr.bf16.mxu1 %v2825_v0 }
 0x156   :  { %1787 = vmatpush1.bf16.msra.mxu0 %v2609_v52 }
 0x157   :  { %2397 = vmatpush3.bf16.msra.mxu1 %v2592_v53  ;;  %1788 = vmatprep.subr.bf16.mxu0 %v2614_v54  ;;  %v388_v53 = vrot.slane %v2961_v49, %v2926_v9 }
 0x158   :  { %2398 = vmatprep.subr.bf16.mxu1 %v2825_v0  ;;  %v2621_v0 = vld [vmem:[#allocation5 + $0xe0] ss:$8 sps:$4 sm:$0xff]  }
 0x15a   :  { %1789 = vmatpush1.bf16.msra.mxu0 %v2612_v55 }
 0x15b   :  { %2399 = vmatpush3.bf16.msra.mxu1 %v2593_v56  ;;  %1790 = vmatprep.subr.bf16.mxu0 %v2617_v57 }
 0x15c   :  { %1817 = vmatprep.subr.bf16.mxu1 %v2641_v58 }
 0x15e   :  { %2401 = vmatmul.mubr.bf16.vlgmr.msra.gmra.mxu1 %v2932_v25  ;;  %1791 = vmatpush1.bf16.msra.mxu0 %v2615_v59  ;;  %v2629_v25 = vld [vmem:[#allocation5 + $0xc4] ss:$8 sps:$4 sm:$0xff]  }
 0x15f   :  { %1792 = vmatprep.subr.bf16.mxu0 %v2620_v60  ;;  %1818 = vmatpush1.bf16.msra.mxu1 %v2639_v61 }
 0x160   :  { %1819 = vmatprep.subr.bf16.mxu1 %v2647_v62 }
 0x162   :  { %1793 = vmatpush2.bf16.msra.mxu0 %v2618_v63 }
 0x163   :  { %1794 = vmatprep.subr.bf16.mxu0 %v2623_v2  ;;  %1820 = vmatpush1.bf16.msra.mxu1 %v2645_v3 }
 0x164   :  { %1821 = vmatprep.subr.bf16.mxu1 %v2650_v4 }
 0x166   :  { %1795 = vmatpush2.bf16.msra.mxu0 %v2621_v0  ;;  %v2687_v0 = vld [vmem:[#allocation5 + $0x270] ss:$8 sps:$4 sm:$0xff]  }
 0x167   :  { %1796 = vmatprep.subr.bf16.mxu0 %v2626_v8  ;;  %1822 = vmatpush1.bf16.msra.mxu1 %v2648_v10  ;;  %v2695_v10 = vld [vmem:[#allocation5 + $0x264] ss:$8 sps:$4 sm:$0xff]  }
 0x168   :  { %1823 = vmatprep.subr.bf16.mxu1 %v2653_v11  ;;  %v2693_v11 = vld [vmem:[#allocation5 + $0x260] ss:$8 sps:$4 sm:$0xff]  }
 0x16a   :  { %1797 = vmatpush2.bf16.msra.mxu0 %v2624_v12  ;;  %v2698_v12 = vld [vmem:[#allocation5 + $0x254] ss:$8 sps:$4 sm:$0xff]  }
 0x16b   :  { %1798 = vmatprep.subr.bf16.mxu0 %v2629_v25  ;;  %1824 = vmatpush1.bf16.msra.mxu1 %v2651_v13  ;;  %v2696_v25 = vld [vmem:[#allocation5 + $0x250] ss:$8 sps:$4 sm:$0xff]   ;;  %v2701_v13 = vld [vmem:[#allocation5 + $0x244] ss:$8 sps:$4 sm:$0xff]  }
 0x16c   :  { %1825 = vmatprep.subr.bf16.mxu1 %v2656_v14  ;;  %v2699_v14 = vld [vmem:[#allocation5 + $0x240] ss:$8 sps:$4 sm:$0xff]  }
 0x16e   :  { %1799 = vmatpush2.bf16.msra.mxu0 %v2627_v15  ;;  %v2704_v15 = vld [vmem:[#allocation5 + $0x234] ss:$8 sps:$4 sm:$0xff]  }
 0x16f   :  { %1800 = vmatprep.subr.bf16.mxu0 %v2632_v16  ;;  %1826 = vmatpush1.bf16.msra.mxu1 %v2654_v17  ;;  %v2702_v16 = vld [vmem:[#allocation5 + $0x230] ss:$8 sps:$4 sm:$0xff]   ;;  %v2707_v17 = vld [vmem:[#allocation5 + $0x224] ss:$8 sps:$4 sm:$0xff]  }
 0x170   :  { %1827 = vmatprep.subr.bf16.mxu1 %v2659_v18  ;;  %v2705_v18 = vld [vmem:[#allocation5 + $0x220] ss:$8 sps:$4 sm:$0xff]  }
 0x172   :  { %1801 = vmatpush2.bf16.msra.mxu0 %v2630_v19  ;;  %v2710_v19 = vld [vmem:[#allocation5 + $0x214] ss:$8 sps:$4 sm:$0xff]  }
 0x173   :  { %1802 = vmatprep.subr.bf16.mxu0 %v2635_v20  ;;  %1828 = vmatpush1.bf16.msra.mxu1 %v2657_v21 }
 0x174   :  { %1829 = vmatprep.subr.bf16.mxu1 %v2662_v22  ;;  %v2713_v22 = vld [vmem:[#allocation5 + $0x204] ss:$8 sps:$4 sm:$0xff]  }
 0x176   :  { %1803 = vmatpush2.bf16.msra.mxu0 %v2633_v23 }
 0x177   :  { %1804 = vmatprep.subr.bf16.mxu0 %v2638_v24  ;;  %1830 = vmatpush1.bf16.msra.mxu1 %v2660_v26  ;;  %v2711_v24 = vld [vmem:[#allocation5 + $0x200] ss:$8 sps:$4 sm:$0xff]  }
 0x178   :  { %1831 = vmatprep.subr.bf16.mxu1 %v2665_v27  ;;  %v395_v27 = vsub.s32 3, %v2916_v5 }
 0x17a   :  { %1805 = vmatpush2.bf16.msra.mxu0 %v2636_v29  ;;  %v392_v29 = vrot.slane %v2961_v49, %v97_v6  ;;  %v399_v6 = vsub.s32 4, %v2916_v5  ;;  %v2719_v5 = vld [vmem:[#allocation7 + $0x28] sm:$0xff]  }
 0x17b   :  { %1806 = vmatprep.subr.bf16.mxu0 %v2644_v30  ;;  %1832 = vmatpush1.bf16.msra.mxu1 %v2663_v31  ;;  %v396_v30 = vrot.slane %v2961_v49, %v395_v27 }
 0x17c   :  { %1833 = vmatprep.subr.bf16.mxu1 %v2668_v32 }
 0x17e   :  { %1807 = vmatpush2.bf16.msra.mxu0 %v2642_v33 }
 0x17f   :  { %1834 = vmatpush2.bf16.msra.mxu1 %v2666_v34  ;;  %1858 = vmatprep.subr.bf16.mxu0 %v2689_v39 }
 0x180   :  { %1835 = vmatprep.subr.bf16.mxu1 %v2671_v35 }
 0x183   :  { %1836 = vmatpush2.bf16.msra.mxu1 %v2669_v36 }
 0x184   :  { %1837 = vmatprep.subr.bf16.mxu1 %v2674_v37 }
 0x187   :  { %1838 = vmatpush2.bf16.msra.mxu1 %v2672_v38 }
 0x188   :  { %1839 = vmatprep.subr.bf16.mxu1 %v2677_v40 }
 0x18b   :  { %1840 = vmatpush2.bf16.msra.mxu1 %v2675_v41 }
 0x18c   :  { %1841 = vmatprep.subr.bf16.mxu1 %v2680_v42 }
 0x18f   :  { %1842 = vmatpush2.bf16.msra.mxu1 %v2678_v43 }
 0x190   :  { %1843 = vmatprep.subr.bf16.mxu1 %v2683_v44 }
 0x193   :  { %1844 = vmatpush2.bf16.msra.mxu1 %v2681_v45 }
 0x194   :  { %1845 = vmatprep.subr.bf16.mxu1 %v2686_v46 }
 0x197   :  { %1846 = vmatpush2.bf16.msra.mxu1 %v2684_v47 }
 0x198   :  { %1847 = vmatprep.subr.bf16.mxu1 %v2692_v28  ;;  %v400_v28 = vrot.slane %v2961_v49, %v399_v6  ;;  %v2720_v49 = vld [vmem:[#allocation7 + $0x60] sm:$0xff]  }
 0x19b   :  { %1848 = vmatpush2.bf16.msra.mxu1 %v2690_v48 }
 0x1bd   :  { %v1105_v50 = vpop.f32.mrf.mxu1 }
 0x1bf   :  { %v1107_v52 = vpop.f32.mrf.mxu1 }
 0x1c1   :  { %v1064_v54 = vpop.f32.mrf.mxu0  ;;  %v1109_v56 = vpop.f32.mrf.mxu1 }
 0x1c2   :  { %v1065_v55 = vadd.f32 %v1064_v54, %v384_v51 }
 0x1c3   :  { %v1066_v57 = vpop.f32.mrf.mxu0  ;;  %v1110_v60 = vpop.f32.mrf.mxu1 }
 0x1c4   :  { %v1106_v58 = vadd.f32 %v1105_v50, %v1065_v55  ;;  %v1067_v59 = vadd.f32 %v1066_v57, %v388_v53  ;;  %v2714_v57 = vld [vmem:[#allocation7 + $0x78] sm:$0xff]   ;;  %v2717_v60 = vld [vmem:[#allocation7 + $0x30] sm:$0xff]  }
 0x1c5   :  { %v1068_v61 = vpop.f32.mrf.mxu0  ;;  %2354 = vmatprep.subr.bf16.mxu1 %v2714_v57 }
 0x1c6   :  { %v1108_v62 = vadd.f32 %v1107_v52, %v1067_v59  ;;  %v1274_v63 = vmax.f32 %v1106_v58, 0.0  ;;  %v2715_v58 = vld [vmem:[#allocation7 + $0x38] sm:$0xff]   ;;  %v2716_v59 = vld [vmem:[#allocation7 + $0x70] sm:$0xff]   ;;  %v2718_v61 = vld [vmem:[#allocation7 + $0x68] sm:$0xff]  }
 0x1c7   :  { %v1069_v2 = vpop.f32.mrf.mxu0 }
 0x1c8   :  { %v1275_v3 = vmax.f32 %v1108_v62, 0.0  ;;  %v1359_v8 = vpack.c.bf16 %v1274_v63, %v1274_v63  ;;  %v2721_v62 = vld [vmem:[#allocation7 + $0x20] sm:$0xff]   ;;  %v2722_v63 = vld [vmem:[#allocation7 + $0x58] sm:$0xff]  }
 0x1c9   :  { %v2723_v2 = vld [vmem:[#allocation7 + $0x18] sm:$0xff]  }
 0x1ca   :  { %v1360_v4 = vpack.c.bf16 %v1275_v3, %v1275_v3  ;;  %v2724_v3 = vld [vmem:[#allocation7 + $0x50] sm:$0xff]  }
 0x1cc   :  { %1808 = vmatprep.mubr.bf16.mxu0 %v1360_v4  ;;  %v2725_v4 = vld [vmem:[#allocation7 + $0x10] sm:$0xff]  }
 0x1cd   :  { %1809 = vmatmul.mubr.bf16.vlgmr.msra.gmra.mxu0 %v1359_v8  ;;  %v2727_v8 = vld [vmem:[#allocation7 + $0x8] sm:$0xff]  }
 0x1ce   :  { %1859 = vmatpush1.bf16.msra.mxu0 %v2687_v0  ;;  %1890 = vmatprep.mubr.bf16.mxu0 %v2827_v1  ;;  %v2708_v1 = vld [vmem:[#allocation5 + $0x210] ss:$8 sps:$4 sm:$0xff]   ;;  %v2726_v0 = vld [vmem:[#allocation7 + $0x48] sm:$0xff]  }
 0x1cf   :  { %1860 = vmatprep.subr.bf16.mxu0 %v2695_v10  ;;  %v2728_v10 = vld [vmem:[#allocation7 + $0x40] sm:$0xff]  }
 0x1d2   :  { %1861 = vmatpush1.bf16.msra.mxu0 %v2693_v11  ;;  %v2729_v11 = vld [vmem:[#allocation7] sm:$0xff]  }
 0x1d3   :  { %1862 = vmatprep.subr.bf16.mxu0 %v2698_v12 }
 0x1d6   :  { %1863 = vmatpush1.bf16.msra.mxu0 %v2696_v25 }
 0x1d7   :  { %1864 = vmatprep.subr.bf16.mxu0 %v2701_v13 }
 0x1da   :  { %1865 = vmatpush1.bf16.msra.mxu0 %v2699_v14 }
 0x1db   :  { %1866 = vmatprep.subr.bf16.mxu0 %v2704_v15 }
 0x1de   :  { %1867 = vmatpush1.bf16.msra.mxu0 %v2702_v16 }
 0x1df   :  { %1868 = vmatprep.subr.bf16.mxu0 %v2707_v17 }
 0x1e1   :  { %v1187_v20 = vpop.f32.mrf.mxu0 }
 0x1e2   :  { %1869 = vmatpush1.bf16.msra.mxu0 %v2705_v18 }
 0x1e3   :  { %v1189_v21 = vpop.f32.mrf.mxu0  ;;  %1870 = vmatprep.subr.bf16.mxu0 %v2710_v19  ;;  %v1364_v19 = vld [vmem:[%s2992_s6] sm:$0x3] }
 0x1e5   :  { %v1191_v23 = vpop.f32.mrf.mxu0 }
 0x1e6   :  { %1871 = vmatpush1.bf16.msra.mxu0 %v2708_v1  ;;  %v1373_v1 = vrot.slane %v1364_v19, %v2926_v9 }
 0x1e7   :  { %v1192_v26 = vpop.f32.mrf.mxu0  ;;  %1872 = vmatprep.subr.bf16.mxu0 %v2713_v22 }
 0x1ea   :  { %1873 = vmatpush1.bf16.msra.mxu0 %v2711_v24 }
 0x1fe   :  { %v1146_v31 = vpop.f32.mrf.mxu1 }
 0x1ff   :  { %v1147_v32 = vadd.f32 %v1146_v31, %v392_v29 }
 0x200   :  { %v1148_v33 = vpop.f32.mrf.mxu1 }
 0x201   :  { %v1188_v34 = vadd.f32 %v1187_v20, %v1147_v32  ;;  %v1149_v35 = vadd.f32 %v1148_v33, %v396_v30  ;;  %v2339_v36 = vpop.f32.mrf.mxu0  ;;  %v1369_v20 = vrot.slane %v1364_v19, %v2920_v7  ;;  %v2303_v7 = vld [vmem:[%s2994_s8] ss:$0 sm:$0xff] }
 0x202   :  { %v1150_v37 = vpop.f32.mrf.mxu1 }
 0x203   :  { %v1190_v38 = vadd.f32 %v1189_v21, %v1149_v35  ;;  %v2340_v39 = vpop.f32.mrf.mxu0  ;;  %v1276_v40 = vmax.f32 %v1188_v34, 0.0 }
 0x204   :  { %v1151_v41 = vpop.f32.mrf.mxu1  ;;  %v2341_v47 = vadd.f32 %v2340_v39, %v2339_v36 }
 0x205   :  { %v1277_v42 = vmax.f32 %v1190_v38, 0.0  ;;  %v2342_v43 = vpop.f32.mrf.mxu0  ;;  %v1361_v46 = vpack.c.bf16 %v1276_v40, %v1276_v40 }
 0x206   :  { %v1229_v48 = vadd.f32 %v2341_v47, %v400_v28 }
 0x207   :  { %v1362_v44 = vpack.c.bf16 %v1277_v42, %v1277_v42  ;;  %v2343_v45 = vpop.f32.mrf.mxu0 }
 0x209   :  { %1849 = vmatprep.mubr.bf16.mxu1 %v1362_v44 }
 0x20a   :  { %1850 = vmatmul.mubr.bf16.vlgmr.msra.gmra.mxu1 %v1361_v46 }
 0x20b   :  { %2355 = vmatpush3.bf16.msra.mxu1 %v2715_v58 }
 0x20c   :  { %2356 = vmatprep.subr.bf16.mxu1 %v2716_v59 }
 0x20f   :  { %2357 = vmatpush3.bf16.msra.mxu1 %v2717_v60 }
 0x210   :  { %2358 = vmatprep.subr.bf16.mxu1 %v2718_v61 }
 0x213   :  { %2359 = vmatpush3.bf16.msra.mxu1 %v2719_v5 }
 0x214   :  { %2360 = vmatprep.subr.bf16.mxu1 %v2720_v49 }
 0x217   :  { %2361 = vmatpush3.bf16.msra.mxu1 %v2721_v62 }
 0x218   :  { %2362 = vmatprep.subr.bf16.mxu1 %v2722_v63 }
 0x21b   :  { %2363 = vmatpush3.bf16.msra.mxu1 %v2723_v2 }
 0x21c   :  { %2364 = vmatprep.subr.bf16.mxu1 %v2724_v3 }
 0x21e   :  { %v1268_v50 = vpop.f32.mrf.mxu1 }
 0x21f   :  { %v1269_v51 = vadd.f32 %v1268_v50, %v1229_v48  ;;  %2365 = vmatpush3.bf16.msra.mxu1 %v2725_v4 }
 0x220   :  { %v2402_v52 = vpop.f32.mrf.mxu1  ;;  %2366 = vmatprep.subr.bf16.mxu1 %v2726_v0 }
 0x221   :  { %v1278_v53 = vmax.f32 %v1269_v51, 0.0 }
 0x222   :  { %v1271_v54 = vpop.f32.mrf.mxu1 }
 0x223   :  { %v1363_v55 = vpack.c.bf16 %v1278_v53, %v1278_v53  ;;  %2367 = vmatpush3.bf16.msra.mxu1 %v2727_v8 }
 0x224   :  { %v2403_v56 = vpop.f32.mrf.mxu1  ;;  %2368 = vmatprep.subr.bf16.mxu1 %v2728_v10 }
 0x225   :  { %1891 = vmatmul.mubr.bf16.vlgmr.msra.gmra.mxu0 %v1363_v55 }
 0x227   :  { %2369 = vmatpush3.bf16.msra.mxu1 %v2729_v11 }
 0x28d   :  { %v1810_v12 = vpop.f32.mrf.mxu0 }
 0x28e   :  { %v1811_v21 = vadd.f32 %v1810_v12, %v1369_v20 }
 0x28f   :  { %v1812_v25 = vpop.f32.mrf.mxu0 }
 0x290   :  { %v1813_v22 = vadd.f32 %v1812_v25, %v1373_v1 }
 0x291   :  { %v1814_v13 = vpop.f32.mrf.mxu0 }
 0x293   :  { %v1815_v14 = vpop.f32.mrf.mxu0 }
 0x2ca   :  { %v1851_v15 = vpop.f32.mrf.mxu1 }
 0x2cb   :  { %v1852_v23 = vadd.f32 %v1851_v15, %v1811_v21 }
 0x2cc   :  { %v1853_v16 = vpop.f32.mrf.mxu1 }
 0x2cd   :  { %v1854_v26 = vadd.f32 %v1853_v16, %v1813_v22 }
 0x2ce   :  { %v1855_v17 = vpop.f32.mrf.mxu1 }
 0x2d0   :  { %v1856_v18 = vpop.f32.mrf.mxu1 }
 0x2e5   :  { %v1892_v24 = vpop.f32.mrf.mxu0 }
 0x2e6   :  { %v1893_v27 = vadd.f32 %v1892_v24, %v1852_v23 }
 0x2e7   :  { %v1894_v29 = vpop.f32.mrf.mxu0 }
 0x2e8   :  { %v1895_v30 = vadd.f32 %v1894_v29, %v1854_v26  ;;  %v1899_v31 = vmax.f32 %v1893_v27, 0.0 }
 0x2e9   :  { %v1896_v32 = vpop.f32.mrf.mxu0 }
 0x2ea   :  { %v1900_v33 = vmax.f32 %v1895_v30, 0.0  ;;  %v1933_v36 = vpack.c.bf16 %v1899_v31, %v1899_v31 }
 0x2eb   :  { %v1897_v34 = vpop.f32.mrf.mxu0 }
 0x2ec   :  { %v1934_v35 = vpack.c.bf16 %v1900_v33, %v1900_v33 }
 0x2ee   :  { %2070 = vmatprep.mubr.bf16.mxu1 %v1934_v35 }
 0x2ef   :  { %2071 = vmatmul.mubr.bf16.vlgmr.msra.gmra.mxu1 %v1933_v36 }
 0x3af   :  { %v2370_v37 = vpop.f32.mrf.mxu1 }
 0x3b1   :  { %v2371_v9 = vpop.f32.mrf.mxu1 }
 0x3b2   :  { %v2372_v38 = vadd.f32 %v2371_v9, %v2370_v37 }
 0x3b3   :  { %v2373_v39 = vpop.f32.mrf.mxu1 }
 0x3b4   :  { %v2073_v40 = vadd.f32 %v2372_v38, %v2303_v7 }
 0x3b5   :  { %v2374_v41 = vpop.f32.mrf.mxu1 }
 0x3b6   :  { %2078 = vst [vmem:[#allocation8] sm:$0x3] %v2073_v40 }
 0x3b7   :  { %2801 = shalt.err (!%p2798_p5)
}
 0x3b8   :  { %2088 = dma.vmem_to_hbm [thread:$0]  %s2086_s24, 32, %s2995_s9, [#allocation4]  }
 0x3b9   :  { %2814 = dma.done.wait [#allocation4], 32  }
 0x3ba   :  { %2815 = vsyncadd [#allocation4], 4294967264 }
 0x3bb   :  { %2092 = vsyncpa [#allocation3], 1 }
 0x3bc   :  { %2093 = vsyncpa [#allocation6], 1 }
 0x3bd   :  { %2094 = vsyncpa [#allocation4], 1 }

</bundles_post_ra>
